<compile_context>
chip_gen: v7x
topology: tpu7x:2x2x1
jax: 0.10.0
libtpu: 0.0.40
codegen_flags: <defaults>
</compile_context>

<pallas_src>
import jax
import jax.numpy as jnp
from jax.experimental import pallas as pl
from jax.experimental.pallas import tpu as pltpu


def logic_circuit_kernel(dwb_ref, x_ref, o_ref):
    # dwb_ref: SMEM (3,) f32 = [dw0, dw1, db] with dwk = w[1,k]-w[0,k], db = b[1]-b[0]
    # x_ref  : VMEM (2, TS, 128) f32 -- x_ref[f] = input feature f for TS*128 batch elems
    # o_ref  : VMEM (2, TS, 128) f32 -- o_ref[c] = softmax probability of class c
    x0 = x_ref[0]                       # (TS, 128) dense slab
    x1 = x_ref[1]

    # Logit difference on the VPU (scalar-broadcast FMAs only).
    d = x0 * dwb_ref[0] + x1 * dwb_ref[1] + dwb_ref[2]

    # 2-class softmax == sigmoid(l1 - l0); exp on EUP, exact divide keeps 1e-6.
    p1 = 1.0 / (1.0 + jnp.exp(-d))
    o_ref[1] = p1.astype(o_ref.dtype)
    o_ref[0] = (1.0 - p1).astype(o_ref.dtype)


def logic_circuit(x, w, b, *, block_rows=2048):
    """x: (B, 2) f32; w: (2, 2) stored (out, in) like torch nn.Linear; b: (2,).
    Returns softmax(x @ w.T + b, axis=1) of shape (B, 2)."""
    B, F = x.shape
    assert F == 2 and w.shape == (2, 2) and b.shape == (2,)
    x = x.astype(jnp.float32)

    # ---- pack batch densely: (B, 2) -> (2, S, 128); zero-pad < 128 elems ----
    S = pl.cdiv(B, 128)                       # number of 128-lane rows
    B_pad = S * 128
    xT = jnp.zeros((2, B_pad), jnp.float32).at[:, :B].set(x.T)
    xp = xT.reshape(2, S, 128)

    # ---- block-row count: big blocks; >=2 blocks when there's enough work ----
    if S <= block_rows:
        if S >= 64:
            TS = pl.cdiv(pl.cdiv(S, 2), 8) * 8   # split in two for megacore (v7x)
        else:
            TS = S                               # single block == full array dim (legal)
    else:
        TS = block_rows                          # (2, 2048, 128) f32 = 2 MiB block
    num_blocks = pl.cdiv(S, TS)

    # ---- precombined scalars: d = (w10-w00)*x0 + (w11-w01)*x1 + (b1-b0) ----
    dwb = jnp.stack([w[1, 0] - w[0, 0],
                     w[1, 1] - w[0, 1],
                     b[1] - b[0]]).astype(jnp.float32)

    op = pl.pallas_call(
        logic_circuit_kernel,
        out_shape=jax.ShapeDtypeStruct((2, S, 128), jnp.float32),
        grid=(num_blocks,),
        in_specs=[
            pl.BlockSpec(memory_space=pltpu.MemorySpace.SMEM),   # 3 scalars in SMEM
            pl.BlockSpec((2, TS, 128), lambda i: (0, i, 0)),
        ],
        out_specs=pl.BlockSpec((2, TS, 128), lambda i: (0, i, 0)),
        compiler_params=pltpu.CompilerParams(
            dimension_semantics=("parallel",)),
    )(dwb, xp)

    return op.reshape(2, B_pad)[:, :B].T


if __name__ == "__main__":
    key = jax.random.PRNGKey(0)
    k_x, k_w, k_b = jax.random.split(key, 3)

    B, IN, OUT = 8, 2, 2
    x = jax.random.normal(k_x, (B, IN), dtype=jnp.float32)

    # Deterministic init mimicking nn.Linear default: U(-1/sqrt(in), 1/sqrt(in))
    bound = 1.0 / jnp.sqrt(jnp.float32(IN))
    w = jax.random.uniform(k_w, (OUT, IN), dtype=jnp.float32, minval=-bound, maxval=bound)
    b = jax.random.uniform(k_b, (OUT,), dtype=jnp.float32, minval=-bound, maxval=bound)

    out = logic_circuit(x, w, b)
    out = jax.block_until_ready(out)

    # Reference (matches torch.softmax(nn.Linear(2,2)(x), dim=1))
    ref = jax.nn.softmax(x @ w.T + b, axis=1)
    assert out.shape == (B, OUT)
    assert jnp.allclose(out, ref, atol=1e-6), "mismatch vs reference"

    print("KERNEL_OK")
</pallas_src>

<mosaic_0001>
module attributes {stable_mosaic.version = 11 : i64} {
  func.func @logic_circuit_kernel(%arg0: i32, %arg1: memref<3xf32, #tpu.memory_space<smem>>, %arg2: memref<2x1x128xf32, #tpu.memory_space<vmem>>, %arg3: memref<2x1x128xf32, #tpu.memory_space<vmem>>) attributes {dimension_semantics = [#tpu.dimension_semantics<parallel>], iteration_bounds = array<i64: 1>, scalar_prefetch = 0 : i64, scratch_operands = 0 : i64, tpu.core_type = #tpu.core_type<tc>, window_params = [{transform_indices = @transform_0, window_bounds = array<i64: 3>}, {transform_indices = @transform_1, window_bounds = array<i64: 2, 1, 128>}, {transform_indices = @transform_2, window_bounds = array<i64: 2, 1, 128>}]} {
    %c0 = arith.constant 0 : index
    %c0_0 = arith.constant 0 : index
    %c0_1 = arith.constant 0 : index
    %0 = vector.load %arg2[%c0, %c0_0, %c0_1] : memref<2x1x128xf32, #tpu.memory_space<vmem>>, vector<1x1x128xf32>
    %1 = vector.shape_cast %0 : vector<1x1x128xf32> to vector<1x128xf32>
    %c1 = arith.constant 1 : index
    %c0_2 = arith.constant 0 : index
    %c0_3 = arith.constant 0 : index
    %2 = vector.load %arg2[%c1, %c0_2, %c0_3] : memref<2x1x128xf32, #tpu.memory_space<vmem>>, vector<1x1x128xf32>
    %3 = vector.shape_cast %2 : vector<1x1x128xf32> to vector<1x128xf32>
    %c0_4 = arith.constant 0 : index
    %4 = memref.load %arg1[%c0_4] : memref<3xf32, #tpu.memory_space<smem>>
    %5 = vector.broadcast %4 : f32 to vector<1x128xf32>
    %6 = arith.mulf %1, %5 : vector<1x128xf32>
    %c1_5 = arith.constant 1 : index
    %7 = memref.load %arg1[%c1_5] : memref<3xf32, #tpu.memory_space<smem>>
    %8 = vector.broadcast %7 : f32 to vector<1x128xf32>
    %9 = arith.mulf %3, %8 : vector<1x128xf32>
    %10 = arith.addf %6, %9 : vector<1x128xf32>
    %c2 = arith.constant 2 : index
    %11 = memref.load %arg1[%c2] : memref<3xf32, #tpu.memory_space<smem>>
    %12 = vector.broadcast %11 : f32 to vector<1x128xf32>
    %13 = arith.addf %10, %12 : vector<1x128xf32>
    %cst = arith.constant 0.000000e+00 : f32
    %14 = vector.broadcast %cst : f32 to vector<1x128xf32>
    %15 = arith.subf %14, %13 : vector<1x128xf32>
    %16 = math.exp %15 : vector<1x128xf32>
    %cst_6 = arith.constant 1.000000e+00 : f32
    %17 = vector.broadcast %cst_6 : f32 to vector<1x128xf32>
    %18 = arith.addf %17, %16 : vector<1x128xf32>
    %cst_7 = arith.constant 1.000000e+00 : f32
    %19 = vector.broadcast %cst_7 : f32 to vector<1x128xf32>
    %20 = arith.divf %19, %18 : vector<1x128xf32>
    %c1_8 = arith.constant 1 : index
    %c0_9 = arith.constant 0 : index
    %c0_10 = arith.constant 0 : index
    %21 = vector.load %arg3[%c1_8, %c0_9, %c0_10] : memref<2x1x128xf32, #tpu.memory_space<vmem>>, vector<1x1x128xf32>
    %22 = vector.shape_cast %21 : vector<1x1x128xf32> to vector<1x128xf32>
    %23 = vector.shape_cast %20 : vector<1x128xf32> to vector<1x1x128xf32>
    tpu.vector_store %arg3[%c1_8, %c0_9, %c0_10], %23 {strides = array<i32>} : memref<2x1x128xf32, #tpu.memory_space<vmem>>, vector<1x1x128xf32>,
    %cst_11 = arith.constant 1.000000e+00 : f32
    %24 = vector.broadcast %cst_11 : f32 to vector<1x128xf32>
    %25 = arith.subf %24, %20 : vector<1x128xf32>
    %c0_12 = arith.constant 0 : index
    %c0_13 = arith.constant 0 : index
    %c0_14 = arith.constant 0 : index
    %26 = vector.load %arg3[%c0_12, %c0_13, %c0_14] : memref<2x1x128xf32, #tpu.memory_space<vmem>>, vector<1x1x128xf32>
    %27 = vector.shape_cast %26 : vector<1x1x128xf32> to vector<1x128xf32>
    %28 = vector.shape_cast %25 : vector<1x128xf32> to vector<1x1x128xf32>
    tpu.vector_store %arg3[%c0_12, %c0_13, %c0_14], %28 {strides = array<i32>} : memref<2x1x128xf32, #tpu.memory_space<vmem>>, vector<1x1x128xf32>,
    return
  }
  func.func @transform_0(%arg0: i32) -> i32 {
    %c0_i32 = arith.constant 0 : i32
    %c0_i32_0 = arith.constant 0 : i32
    return %c0_i32 : i32
  }
  func.func @transform_1(%arg0: i32) -> (i32, i32, i32) {
    %c0_i32 = arith.constant 0 : i32
    %c0_i32_0 = arith.constant 0 : i32
    %c0_i32_1 = arith.constant 0 : i32
    return %c0_i32, %arg0, %c0_i32_0 : i32, i32, i32
  }
  func.func @transform_2(%arg0: i32) -> (i32, i32, i32) {
    %c0_i32 = arith.constant 0 : i32
    %c0_i32_0 = arith.constant 0 : i32
    %c0_i32_1 = arith.constant 0 : i32
    return %c0_i32, %arg0, %c0_i32_0 : i32, i32, i32
  }
}

</mosaic_0001>

<bundles_post_ra>
// kernel: tpu_custom_call.1
= control target key start
LH: loop header
LB: loop body
LE: loop exit
PB: predicated region body
PF: predicated region fallthrough
CT: control target
= control target key end

     0   :  { %7 = vsyncpa [#allocation4], 0  ;;  %s159_s0 = inlined_call_operand.hbm [shape: f32[3], index: 0, kind: input, shape index: {}]   ;;  %s160_s1 = inlined_call_operand.vmem [shape: f32[2,1,128], index: 1, kind: input, shape index: {}]   ;;  %s161_s2 = inlined_call_operand.hbm [shape: f32[2,1,128], index: 2, kind: output, shape index: {}]  }
   0x1   :  { %8 = vsyncpa [#allocation3], 0  ;;  %s74_s11 = scalar_lea.hbm %s159_s0, 16 }
   0x2   :  { %p75_p0 = scmp.ne.s32.totalorder %s159_s0, %s74_s11  ;;  %p78_p1 = scmp.lt.u32.totalorder %s74_s11, %s159_s0 }
   0x4   :  { %p80_p2 = pnand %p78_p1, %p75_p0 }
   0x6   :  { %83 = shalt.err (!%p80_p2)
}
   0x7   :  { %s110_s16 = smov [#allocation2]  }
   0x8   :  { %16 = dma.hbm_to_smem %s159_s0, 16, %s110_s16, [#allocation4]  }
   0x9   :  { %106 = dma.done.wait [#allocation4], 16  }
   0xa   :  { %107 = vsyncadd [#allocation4], 4294967280 }
   0xb   :  { %22 = sfence }
   0xc   :  { %s26_s19 = sld [smem:[#allocation2]]  ;;  %s64_s20 = sld [smem:[#allocation2 + $0x1]]  ;;  %v23_v0 = vld [vmem:[%s160_s1] sm:$0x1]  ;;  %v63_v1 = vld [vmem:[%s160_s1 + $0x1] sm:$0x1] }
   0xd   :  { %s65_s21 = sld [smem:[#allocation2 + $0x2]]  ;;  %s111_s0 = smov [#allocation5]  }
   0xe   :  { %s51_s26 = sshll.u32 %s111_s0, 4  ;;  %s52_s26 = int_to_ptr.vmem [resolvable:$true] %s51_s26 }
   0xf   :  { %s84_s1 = scalar_lea.vmem %s52_s26, 32  ;;  %p89_p4 = scmp.lt.s32.totalorder %s52_s26, %s52_s26 }
  0x10   :  { %p85_p3 = scmp.ne.s32.totalorder %s52_s26, %s84_s1  ;;  %p90_p5 = scmp.lt.s32.totalorder %s84_s1, %s84_s1 }
  0x12   :  { %v27_v2 = vstv %s26_s19  ;;  %v30_v4 = vstv %s64_s20  ;;  %p91_p6 = por %p90_p5, %p89_p4 }
  0x13   :  { %v28_v3 = vmul.f32 %v27_v2, %v23_v0  ;;  %v31_v5 = vmul.f32 %v63_v1, %v30_v4  ;;  %v34_v6 = vstv %s65_s21 }
  0x14   :  { %p92_p7 = pnand %p91_p6, %p85_p3 }
  0x15   :  { %v32_v7 = vadd.f32 %v31_v5, %v28_v3 }
  0x17   :  { %v35_v8 = vadd.f32 %v34_v6, %v32_v7 }
  0x19   :  { %v36_v9 = vsub.f32 0.0, %v35_v8 }
  0x1b   :  { %v37_v10 = vmul.f32 1.442695, %v36_v9 }
  0x1d   :  { %70 = vpow2.f32 %v37_v10 }
  0x27   :  { %v71_v11 = vpop.eup %70 }
  0x28   :  { %v39_v12 = vadd.f32 1.0, %v71_v11 }
  0x2a   :  { %72 = vrcp.f32 %v39_v12 }
  0x34   :  { %v73_v13 = vpop.eup %72 }
  0x35   :  { %43 = vst [vmem:[#allocation5 + $0x1] sm:$0x1] %v73_v13  ;;  %v44_v14 = vsub.f32 1.0, %v73_v13 }
  0x37   :  { %45 = vst [vmem:[#allocation5] sm:$0x1] %v44_v14 }
  0x38   :  { %95 = shalt.err (!%p92_p7)
}
  0x39   :  { %s96_s29 = scalar_lea.hbm %s161_s2, 32 }
  0x3a   :  { %p97_p8 = scmp.ne.s32.totalorder %s161_s2, %s96_s29  ;;  %p100_p9 = scmp.lt.u32.totalorder %s96_s29, %s161_s2 }
  0x3c   :  { %p102_p10 = pnand %p100_p9, %p97_p8 }
  0x3e   :  { %105 = shalt.err (!%p102_p10)
}
  0x3f   :  { %s112_s6 = smov 16   ;;  %s113_s7 = smov 1  }
  0x40   :  { %57 = dma.vmem_to_hbm [thread:$0]  %s52_s26, 32, %s161_s2, [#allocation3], %s112_s6, %s112_s6, %s113_s7  }
  0x41   :  { %108 = dma.done.wait [#allocation3], 32  }
  0x42   :  { %109 = vsyncadd [#allocation3], 4294967264 }
  0x43   :  { %61 = vsyncpa [#allocation3], 1 }
  0x44   :  { %62 = vsyncpa [#allocation4], 1 }

</bundles_post_ra>
